<compile_context>
chip_gen: v6e
topology: v6e:2x2x1
jax: 0.10.0
libtpu: 0.0.40
codegen_flags: <defaults>
</compile_context>

<pallas_src>
import functools
import math

import numpy as np
import jax
import jax.numpy as jnp
from jax.experimental import pallas as pl
from jax.experimental.pallas import tpu as pltpu

F32_MAX = float(np.finfo(np.float32).max)


# ----------------------------------------------------------------------------
# Fused attention kernel (one grid step == one batch element)
# ----------------------------------------------------------------------------
def _attention_kernel(x_ref, kx_ref, mask_ref, bias_ref,
                      wq_ref, wk_ref, wv_ref, wks_ref, wo_ref, out_ref,
                      *, num_heads, head_dim):
    """QKV projection, edge-biased attention, softmax, output projection.

    x_ref    : [Tq, D]      query-side states for this batch element
    kx_ref   : [Tk, D]      key-side states
    mask_ref : [Tq, Tk]     additive mask (1 = masked)
    bias_ref : [Tq, Tk]     dense edge-bias map
    wq/wk/wv : [D, H*A]     head-fused projection weights
    wks_ref  : [H, D]       key weights pre-summed over the per-head dim A
    wo_ref   : [H*A, D]     head-fused output projection
    out_ref  : [Tq, D]
    """
    inv_sqrt = 1.0 / math.sqrt(float(head_dim))

    xq = x_ref[...]                                   # [Tq, D]
    xk = kx_ref[...]                                  # [Tk, D]

    # --- head-fused projections (wide matmuls; 1/sqrt(A) folded into q) -----
    q = jnp.dot(xq, wq_ref[...], preferred_element_type=jnp.float32) * inv_sqrt  # [Tq, H*A]
    k = jnp.dot(xk, wk_ref[...], preferred_element_type=jnp.float32)             # [Tk, H*A]
    v = jnp.dot(xk, wv_ref[...], preferred_element_type=jnp.float32)             # [Tk, H*A]

    # --- per-head key-sums for the edge-bias term, one matmul for all heads --
    # ksum[h, t] = sum_a (xk @ Wk)[t, h, a] = xk[t, :] . sum_a Wk[:, h, a]
    ksum = jax.lax.dot_general(wks_ref[...], xk, (((1,), (1,)), ((), ())),
                               preferred_element_type=jnp.float32)               # [H, Tk]

    # --- head-invariant terms, computed once -------------------------------
    neg_mask = mask_ref[...] * F32_MAX                # [Tq, Tk]
    bias_s = bias_ref[...] * inv_sqrt                 # 1/sqrt(A) folded into the bias map

    ctx_heads = []
    for h in range(num_heads):
        sl = slice(h * head_dim, (h + 1) * head_dim)
        qh = q[:, sl]                                 # [Tq, A]
        kh = k[:, sl]                                 # [Tk, A]
        vh = v[:, sl]                                 # [Tk, A]

        # alpha[q, t] = (q . k + bias * sum_a(k)) / sqrt(A) - mask * F32_MAX
        alpha = jax.lax.dot_general(qh, kh, (((1,), (1,)), ((), ())),
                                    preferred_element_type=jnp.float32)          # [Tq, Tk]
        alpha = alpha + bias_s * ksum[h:h + 1, :] - neg_mask

        m = jnp.max(alpha, axis=-1, keepdims=True)
        e = jnp.exp(alpha - m)
        denom = jnp.sum(e, axis=-1, keepdims=True)
        ctx = jnp.dot(e, vh, preferred_element_type=jnp.float32)                 # [Tq, A]
        # deferred softmax normalization on the [Tq, A] context (not [Tq, Tk])
        ctx_heads.append(ctx * pl.reciprocal(denom, approx=False))

    # --- head-fused output projection ---------------------------------------
    ctx_all = ctx_heads[0] if num_heads == 1 else jnp.concatenate(ctx_heads, axis=-1)  # [Tq, H*A]
    out_ref[...] = jnp.dot(ctx_all, wo_ref[...], preferred_element_type=jnp.float32)   # [Tq, D]


# ----------------------------------------------------------------------------
# Pallas-based AttentionLayer forward
# ----------------------------------------------------------------------------
def attention_layer_forward_pallas(states, key_states, masks, attention_bias,
                                   params, num_heads):
    B, Tq, D = states.shape
    kst = states if key_states is None else key_states
    Tk = kst.shape[1]
    H = num_heads
    A = params['attn_query'].shape[-1]          # attention_dim_per_head

    if masks is None:
        masks = jnp.zeros((B, Tq, Tk), jnp.float32)

    # --- JAX glue: sparse (edge_type, batch, key, query) -> dense [B, Tq, Tk] bias map
    ab = attention_bias
    bias_vals = (params['bias_embs'][ab[:, 0]] @ params['bias_scalar'])[:, 0]
    bias_dense = jnp.zeros((B, Tq, Tk), jnp.float32).at[
        ab[:, 1], ab[:, 2], ab[:, 3]].set(bias_vals)

    # --- head-fused weight layouts ------------------------------------------
    wq_f = params['attn_query'].reshape(D, H * A)     # [D, H*A]
    wk_f = params['attn_keys'].reshape(D, H * A)
    wv_f = params['attn_values'].reshape(D, H * A)
    wo_f = params['weight_out'].reshape(H * A, D)     # [H*A, D]
    wk_sum = jnp.transpose(params['attn_keys'].sum(-1), (1, 0))   # [H, D]

    kernel = functools.partial(_attention_kernel, num_heads=H, head_dim=A)

    out = pl.pallas_call(
        kernel,
        out_shape=jax.ShapeDtypeStruct((B, Tq, D), jnp.float32),
        grid=(B,),
        in_specs=[
            pl.BlockSpec((None, Tq, D), lambda b: (b, 0, 0)),    # states (this batch)
            pl.BlockSpec((None, Tk, D), lambda b: (b, 0, 0)),    # key states
            pl.BlockSpec((None, Tq, Tk), lambda b: (b, 0, 0)),   # mask
            pl.BlockSpec((None, Tq, Tk), lambda b: (b, 0, 0)),   # dense edge bias
            pl.BlockSpec((D, H * A), lambda b: (0, 0)),          # Wq (head-fused)
            pl.BlockSpec((D, H * A), lambda b: (0, 0)),          # Wk
            pl.BlockSpec((D, H * A), lambda b: (0, 0)),          # Wv
            pl.BlockSpec((H, D), lambda b: (0, 0)),              # Wk column-sums
            pl.BlockSpec((H * A, D), lambda b: (0, 0)),          # Wout (head-fused)
        ],
        out_specs=pl.BlockSpec((None, Tq, D), lambda b: (b, 0, 0)),
        compiler_params=pltpu.CompilerParams(
            dimension_semantics=("parallel",)),                   # shards batch over v7x's 2 TCs
    )(states, kst, masks, bias_dense, wq_f, wk_f, wv_f, wk_sum, wo_f)

    return out


# ----------------------------------------------------------------------------
# Pure-JAX reference (mirrors the PyTorch AttentionLayer.forward exactly)
# ----------------------------------------------------------------------------
def attention_layer_forward_ref(states, key_states, masks, attention_bias,
                                params, num_heads):
    kst = states if key_states is None else key_states
    A = params['attn_query'].shape[-1]

    q = jnp.einsum('btd,dha->btha', states, params['attn_query'])
    k = jnp.einsum('btd,dha->btha', kst, params['attn_keys'])
    v = jnp.einsum('btd,dha->btha', kst, params['attn_values'])

    alpha = jnp.einsum('bkha,bqha->bhqk', k, q)

    ab = attention_bias
    bias_vals = (params['bias_embs'][ab[:, 0]] @ params['bias_scalar'])[:, 0]
    B, H, Tq, Tk = alpha.shape
    bs = jnp.zeros((B, Tq, Tk), jnp.float32).at[ab[:, 1], ab[:, 2], ab[:, 3]].set(bias_vals)
    ksum = k.sum(-1)                                            # [B, Tk, H]
    alpha = alpha + jnp.einsum('bqk,bkh->bhqk', bs, ksum)

    alpha = alpha * (1.0 / math.sqrt(float(A)))
    if masks is not None:
        alpha = alpha - masks[:, None] * F32_MAX
    alpha = jax.nn.softmax(alpha, axis=-1)

    ctx = jnp.einsum('bhqk,bkha->bqha', alpha, v)
    return jnp.einsum('btha,had->btd', ctx, params['weight_out'])


# ----------------------------------------------------------------------------
# deterministic parameter init (shapes follow the module __init__)
# ----------------------------------------------------------------------------
def init_params(key, hidden_dim, attention_dim, num_heads, bias_dim):
    A = attention_dim // num_heads
    ks = jax.random.split(key, 6)
    u = lambda kk, shp: jax.random.uniform(kk, shp, jnp.float32, -0.3, 0.3)
    return dict(
        attn_query=u(ks[0], (hidden_dim, num_heads, A)),
        attn_keys=u(ks[1], (hidden_dim, num_heads, A)),
        attn_values=u(ks[2], (hidden_dim, num_heads, A)),
        weight_out=u(ks[3], (num_heads, A, hidden_dim)),
        bias_embs=u(ks[4], (bias_dim, A)),
        bias_scalar=u(ks[5], (A, 1)),
    )


# ----------------------------------------------------------------------------
if __name__ == "__main__":
    B, S, D = 2, 8, 32
    num_heads = 2
    attention_dim = 32
    bias_dim = 4

    key = jax.random.PRNGKey(0)
    kp, k1, k2 = jax.random.split(key, 3)
    params = init_params(kp, D, attention_dim, num_heads, bias_dim)

    states = jax.random.normal(k1, (B, S, D), jnp.float32)
    masks = jax.random.bernoulli(k2, 0.2, (B, S, S)).astype(jnp.float32)
    # sparse bias edges: rows = (edge_type, batch_index, key_index, query_index)
    attention_bias = jnp.asarray(np.array([
        [0, 0, 1, 2],
        [1, 0, 3, 4],
        [2, 1, 0, 5],
        [3, 1, 2, 2],
        [1, 0, 6, 7],
        [2, 1, 7, 1],
    ], dtype=np.int32))

    out = attention_layer_forward_pallas(states, None, masks, attention_bias,
                                         params, num_heads)
    out = jax.block_until_ready(out)

    ref = attention_layer_forward_ref(states, None, masks, attention_bias,
                                      params, num_heads)
    ref = jax.block_until_ready(ref)

    np.testing.assert_allclose(np.asarray(out), np.asarray(ref), rtol=2e-3, atol=2e-3)
    print("KERNEL_OK")
</pallas_src>

<mosaic_0001>
module attributes {stable_mosaic.version = 11 : i64} {
  func.func @_attention_kernel(%arg0: i32, %arg1: memref<1x8x32xf32, #tpu.memory_space<vmem>>, %arg2: memref<1x8x32xf32, #tpu.memory_space<vmem>>, %arg3: memref<1x8x8xf32, #tpu.memory_space<vmem>>, %arg4: memref<1x8x8xf32, #tpu.memory_space<vmem>>, %arg5: memref<32x32xf32, #tpu.memory_space<vmem>>, %arg6: memref<32x32xf32, #tpu.memory_space<vmem>>, %arg7: memref<32x32xf32, #tpu.memory_space<vmem>>, %arg8: memref<2x32xf32, #tpu.memory_space<vmem>>, %arg9: memref<32x32xf32, #tpu.memory_space<vmem>>, %arg10: memref<1x8x32xf32, #tpu.memory_space<vmem>>) attributes {dimension_semantics = [#tpu.dimension_semantics<parallel>], iteration_bounds = array<i64: 2>, scalar_prefetch = 0 : i64, scratch_operands = 0 : i64, tpu.core_type = #tpu.core_type<tc>, window_params = [{transform_indices = @transform_0, window_bounds = array<i64: 1, 8, 32>}, {transform_indices = @transform_1, window_bounds = array<i64: 1, 8, 32>}, {transform_indices = @transform_2, window_bounds = array<i64: 1, 8, 8>}, {transform_indices = @transform_3, window_bounds = array<i64: 1, 8, 8>}, {pipeline_mode = #tpu.pipeline_mode<synchronous>, transform_indices = @transform_4, window_bounds = array<i64: 32, 32>}, {pipeline_mode = #tpu.pipeline_mode<synchronous>, transform_indices = @transform_5, window_bounds = array<i64: 32, 32>}, {pipeline_mode = #tpu.pipeline_mode<synchronous>, transform_indices = @transform_6, window_bounds = array<i64: 32, 32>}, {pipeline_mode = #tpu.pipeline_mode<synchronous>, transform_indices = @transform_7, window_bounds = array<i64: 2, 32>}, {pipeline_mode = #tpu.pipeline_mode<synchronous>, transform_indices = @transform_8, window_bounds = array<i64: 32, 32>}, {transform_indices = @transform_9, window_bounds = array<i64: 1, 8, 32>}]} {
    %c0 = arith.constant 0 : index
    %c0_0 = arith.constant 0 : index
    %c0_1 = arith.constant 0 : index
    %0 = vector.load %arg1[%c0, %c0_0, %c0_1] : memref<1x8x32xf32, #tpu.memory_space<vmem>>, vector<1x8x32xf32>
    %1 = vector.shape_cast %0 : vector<1x8x32xf32> to vector<8x32xf32>
    %c0_2 = arith.constant 0 : index
    %c0_3 = arith.constant 0 : index
    %c0_4 = arith.constant 0 : index
    %2 = vector.load %arg2[%c0_2, %c0_3, %c0_4] : memref<1x8x32xf32, #tpu.memory_space<vmem>>, vector<1x8x32xf32>
    %3 = vector.shape_cast %2 : vector<1x8x32xf32> to vector<8x32xf32>
    %c0_5 = arith.constant 0 : index
    %c0_6 = arith.constant 0 : index
    %4 = vector.load %arg5[%c0_5, %c0_6] : memref<32x32xf32, #tpu.memory_space<vmem>>, vector<32x32xf32>
    %cst = arith.constant dense<0.000000e+00> : vector<8x32xf32>
    %5 = tpu.matmul %1, %4, %cst {dimension_numbers = #tpu.dot_dimension_numbers<[1], [0], [0], [1], [0, 0, 1, 1], [], []>} : vector<8x32xf32>, vector<32x32xf32>, vector<8x32xf32> -> vector<8x32xf32>
    %cst_7 = arith.constant 2.500000e-01 : f32
    %6 = vector.broadcast %cst_7 : f32 to vector<8x32xf32>
    %7 = arith.mulf %5, %6 : vector<8x32xf32>
    %c0_8 = arith.constant 0 : index
    %c0_9 = arith.constant 0 : index
    %8 = vector.load %arg6[%c0_8, %c0_9] : memref<32x32xf32, #tpu.memory_space<vmem>>, vector<32x32xf32>
    %cst_10 = arith.constant dense<0.000000e+00> : vector<8x32xf32>
    %9 = tpu.matmul %3, %8, %cst_10 {dimension_numbers = #tpu.dot_dimension_numbers<[1], [0], [0], [1], [0, 0, 1, 1], [], []>} : vector<8x32xf32>, vector<32x32xf32>, vector<8x32xf32> -> vector<8x32xf32>
    %c0_11 = arith.constant 0 : index
    %c0_12 = arith.constant 0 : index
    %10 = vector.load %arg7[%c0_11, %c0_12] : memref<32x32xf32, #tpu.memory_space<vmem>>, vector<32x32xf32>
    %cst_13 = arith.constant dense<0.000000e+00> : vector<8x32xf32>
    %11 = tpu.matmul %3, %10, %cst_13 {dimension_numbers = #tpu.dot_dimension_numbers<[1], [0], [0], [1], [0, 0, 1, 1], [], []>} : vector<8x32xf32>, vector<32x32xf32>, vector<8x32xf32> -> vector<8x32xf32>
    %c0_14 = arith.constant 0 : index
    %c0_15 = arith.constant 0 : index
    %12 = vector.load %arg8[%c0_14, %c0_15] : memref<2x32xf32, #tpu.memory_space<vmem>>, vector<2x32xf32>
    %cst_16 = arith.constant dense<0.000000e+00> : vector<2x8xf32>
    %13 = tpu.matmul %12, %3, %cst_16 {dimension_numbers = #tpu.dot_dimension_numbers<[1], [1], [0], [0], [0, 0, 1, 0], [], []>} : vector<2x32xf32>, vector<8x32xf32>, vector<2x8xf32> -> vector<2x8xf32>
    %c0_17 = arith.constant 0 : index
    %c0_18 = arith.constant 0 : index
    %c0_19 = arith.constant 0 : index
    %14 = vector.load %arg3[%c0_17, %c0_18, %c0_19] : memref<1x8x8xf32, #tpu.memory_space<vmem>>, vector<1x8x8xf32>
    %15 = vector.shape_cast %14 : vector<1x8x8xf32> to vector<8x8xf32>
    %cst_20 = arith.constant 3.40282347E+38 : f32
    %16 = vector.broadcast %cst_20 : f32 to vector<8x8xf32>
    %17 = arith.mulf %15, %16 : vector<8x8xf32>
    %c0_21 = arith.constant 0 : index
    %c0_22 = arith.constant 0 : index
    %c0_23 = arith.constant 0 : index
    %18 = vector.load %arg4[%c0_21, %c0_22, %c0_23] : memref<1x8x8xf32, #tpu.memory_space<vmem>>, vector<1x8x8xf32>
    %19 = vector.shape_cast %18 : vector<1x8x8xf32> to vector<8x8xf32>
    %cst_24 = arith.constant 2.500000e-01 : f32
    %20 = vector.broadcast %cst_24 : f32 to vector<8x8xf32>
    %21 = arith.mulf %19, %20 : vector<8x8xf32>
    %22 = vector.extract_strided_slice %7 {offsets = [0, 0], sizes = [8, 16], strides = [1, 1]} : vector<8x32xf32> to vector<8x16xf32>
    %23 = vector.extract_strided_slice %9 {offsets = [0, 0], sizes = [8, 16], strides = [1, 1]} : vector<8x32xf32> to vector<8x16xf32>
    %24 = vector.extract_strided_slice %11 {offsets = [0, 0], sizes = [8, 16], strides = [1, 1]} : vector<8x32xf32> to vector<8x16xf32>
    %cst_25 = arith.constant dense<0.000000e+00> : vector<8x8xf32>
    %25 = tpu.matmul %22, %23, %cst_25 {dimension_numbers = #tpu.dot_dimension_numbers<[1], [1], [0], [0], [0, 0, 1, 0], [], []>} : vector<8x16xf32>, vector<8x16xf32>, vector<8x8xf32> -> vector<8x8xf32>
    %26 = vector.extract_strided_slice %13 {offsets = [0, 0], sizes = [1, 8], strides = [1, 1]} : vector<2x8xf32> to vector<1x8xf32>
    %27 = vector.broadcast %26 : vector<1x8xf32> to vector<8x8xf32>
    %28 = arith.mulf %21, %27 : vector<8x8xf32>
    %29 = arith.addf %25, %28 : vector<8x8xf32>
    %30 = arith.subf %29, %17 : vector<8x8xf32>
    %cst_26 = arith.constant dense<0xFF800000> : vector<8xf32>
    %31 = vector.multi_reduction <maximumf>, %30, %cst_26 [1] : vector<8x8xf32> to vector<8xf32>
    %32 = vector.shape_cast %31 : vector<8xf32> to vector<8x1xf32>
    %33 = vector.broadcast %32 : vector<8x1xf32> to vector<8x8xf32>
    %34 = arith.subf %30, %33 : vector<8x8xf32>
    %35 = math.exp %34 : vector<8x8xf32>
    %cst_27 = arith.constant dense<0.000000e+00> : vector<8xf32>
    %36 = vector.multi_reduction <add>, %35, %cst_27 [1] : vector<8x8xf32> to vector<8xf32>
    %37 = vector.shape_cast %36 : vector<8xf32> to vector<8x1xf32>
    %cst_28 = arith.constant dense<0.000000e+00> : vector<8x16xf32>
    %38 = tpu.matmul %35, %24, %cst_28 {dimension_numbers = #tpu.dot_dimension_numbers<[1], [0], [0], [1], [0, 0, 1, 1], [], []>} : vector<8x8xf32>, vector<8x16xf32>, vector<8x16xf32> -> vector<8x16xf32>
    %39 = tpu.reciprocal %37 : vector<8x1xf32> -> vector<8x1xf32>
    %40 = vector.broadcast %39 : vector<8x1xf32> to vector<8x16xf32>
    %41 = arith.mulf %38, %40 : vector<8x16xf32>
    %42 = vector.extract_strided_slice %7 {offsets = [0, 16], sizes = [8, 16], strides = [1, 1]} : vector<8x32xf32> to vector<8x16xf32>
    %43 = vector.extract_strided_slice %9 {offsets = [0, 16], sizes = [8, 16], strides = [1, 1]} : vector<8x32xf32> to vector<8x16xf32>
    %44 = vector.extract_strided_slice %11 {offsets = [0, 16], sizes = [8, 16], strides = [1, 1]} : vector<8x32xf32> to vector<8x16xf32>
    %cst_29 = arith.constant dense<0.000000e+00> : vector<8x8xf32>
    %45 = tpu.matmul %42, %43, %cst_29 {dimension_numbers = #tpu.dot_dimension_numbers<[1], [1], [0], [0], [0, 0, 1, 0], [], []>} : vector<8x16xf32>, vector<8x16xf32>, vector<8x8xf32> -> vector<8x8xf32>
    %46 = vector.extract_strided_slice %13 {offsets = [1, 0], sizes = [1, 8], strides = [1, 1]} : vector<2x8xf32> to vector<1x8xf32>
    %47 = vector.broadcast %46 : vector<1x8xf32> to vector<8x8xf32>
    %48 = arith.mulf %21, %47 : vector<8x8xf32>
    %49 = arith.addf %45, %48 : vector<8x8xf32>
    %50 = arith.subf %49, %17 : vector<8x8xf32>
    %cst_30 = arith.constant dense<0xFF800000> : vector<8xf32>
    %51 = vector.multi_reduction <maximumf>, %50, %cst_30 [1] : vector<8x8xf32> to vector<8xf32>
    %52 = vector.shape_cast %51 : vector<8xf32> to vector<8x1xf32>
    %53 = vector.broadcast %52 : vector<8x1xf32> to vector<8x8xf32>
    %54 = arith.subf %50, %53 : vector<8x8xf32>
    %55 = math.exp %54 : vector<8x8xf32>
    %cst_31 = arith.constant dense<0.000000e+00> : vector<8xf32>
    %56 = vector.multi_reduction <add>, %55, %cst_31 [1] : vector<8x8xf32> to vector<8xf32>
    %57 = vector.shape_cast %56 : vector<8xf32> to vector<8x1xf32>
    %cst_32 = arith.constant dense<0.000000e+00> : vector<8x16xf32>
    %58 = tpu.matmul %55, %44, %cst_32 {dimension_numbers = #tpu.dot_dimension_numbers<[1], [0], [0], [1], [0, 0, 1, 1], [], []>} : vector<8x8xf32>, vector<8x16xf32>, vector<8x16xf32> -> vector<8x16xf32>
    %59 = tpu.reciprocal %57 : vector<8x1xf32> -> vector<8x1xf32>
    %60 = vector.broadcast %59 : vector<8x1xf32> to vector<8x16xf32>
    %61 = arith.mulf %58, %60 : vector<8x16xf32>
    %62 = tpu.concatenate %41, %61 in 1 : vector<8x16xf32>, vector<8x16xf32> -> vector<8x32xf32>
    %c0_33 = arith.constant 0 : index
    %c0_34 = arith.constant 0 : index
    %63 = vector.load %arg9[%c0_33, %c0_34] : memref<32x32xf32, #tpu.memory_space<vmem>>, vector<32x32xf32>
    %cst_35 = arith.constant dense<0.000000e+00> : vector<8x32xf32>
    %64 = tpu.matmul %62, %63, %cst_35 {dimension_numbers = #tpu.dot_dimension_numbers<[1], [0], [0], [1], [0, 0, 1, 1], [], []>} : vector<8x32xf32>, vector<32x32xf32>, vector<8x32xf32> -> vector<8x32xf32>
    %c0_36 = arith.constant 0 : index
    %c0_37 = arith.constant 0 : index
    %c0_38 = arith.constant 0 : index
    %65 = vector.load %arg10[%c0_36, %c0_37, %c0_38] : memref<1x8x32xf32, #tpu.memory_space<vmem>>, vector<1x8x32xf32>
    %66 = vector.shape_cast %65 : vector<1x8x32xf32> to vector<8x32xf32>
    %67 = vector.shape_cast %64 : vector<8x32xf32> to vector<1x8x32xf32>
    tpu.vector_store %arg10[%c0_36, %c0_37, %c0_38], %67 {strides = array<i32>} : memref<1x8x32xf32, #tpu.memory_space<vmem>>, vector<1x8x32xf32>,
    return
  }
  func.func @transform_0(%arg0: i32) -> (i32, i32, i32) {
    %c0_i32 = arith.constant 0 : i32
    %c0_i32_0 = arith.constant 0 : i32
    %c0_i32_1 = arith.constant 0 : i32
    return %arg0, %c0_i32, %c0_i32_0 : i32, i32, i32
  }
  func.func @transform_1(%arg0: i32) -> (i32, i32, i32) {
    %c0_i32 = arith.constant 0 : i32
    %c0_i32_0 = arith.constant 0 : i32
    %c0_i32_1 = arith.constant 0 : i32
    return %arg0, %c0_i32, %c0_i32_0 : i32, i32, i32
  }
  func.func @transform_2(%arg0: i32) -> (i32, i32, i32) {
    %c0_i32 = arith.constant 0 : i32
    %c0_i32_0 = arith.constant 0 : i32
    %c0_i32_1 = arith.constant 0 : i32
    return %arg0, %c0_i32, %c0_i32_0 : i32, i32, i32
  }
  func.func @transform_3(%arg0: i32) -> (i32, i32, i32) {
    %c0_i32 = arith.constant 0 : i32
    %c0_i32_0 = arith.constant 0 : i32
    %c0_i32_1 = arith.constant 0 : i32
    return %arg0, %c0_i32, %c0_i32_0 : i32, i32, i32
  }
  func.func @transform_4(%arg0: i32) -> (i32, i32) {
    %c0_i32 = arith.constant 0 : i32
    %c0_i32_0 = arith.constant 0 : i32
    %c0_i32_1 = arith.constant 0 : i32
    return %c0_i32, %c0_i32_0 : i32, i32
  }
  func.func @transform_5(%arg0: i32) -> (i32, i32) {
    %c0_i32 = arith.constant 0 : i32
    %c0_i32_0 = arith.constant 0 : i32
    %c0_i32_1 = arith.constant 0 : i32
    return %c0_i32, %c0_i32_0 : i32, i32
  }
  func.func @transform_6(%arg0: i32) -> (i32, i32) {
    %c0_i32 = arith.constant 0 : i32
    %c0_i32_0 = arith.constant 0 : i32
    %c0_i32_1 = arith.constant 0 : i32
    return %c0_i32, %c0_i32_0 : i32, i32
  }
  func.func @transform_7(%arg0: i32) -> (i32, i32) {
    %c0_i32 = arith.constant 0 : i32
    %c0_i32_0 = arith.constant 0 : i32
    %c0_i32_1 = arith.constant 0 : i32
    return %c0_i32, %c0_i32_0 : i32, i32
  }
  func.func @transform_8(%arg0: i32) -> (i32, i32) {
    %c0_i32 = arith.constant 0 : i32
    %c0_i32_0 = arith.constant 0 : i32
    %c0_i32_1 = arith.constant 0 : i32
    return %c0_i32, %c0_i32_0 : i32, i32
  }
  func.func @transform_9(%arg0: i32) -> (i32, i32, i32) {
    %c0_i32 = arith.constant 0 : i32
    %c0_i32_0 = arith.constant 0 : i32
    %c0_i32_1 = arith.constant 0 : i32
    return %arg0, %c0_i32, %c0_i32_0 : i32, i32, i32
  }
}

</mosaic_0001>

<bundles_post_ra>
// kernel: tpu_custom_call.1
= control target key start
LH: loop header
LB: loop body
LE: loop exit
PB: predicated region body
PF: predicated region fallthrough
CT: control target
= control target key end

     0   :  { %s2451_s0 = inlined_call_operand.hbm [shape: f32[2,8,32], index: 0, kind: input, shape index: {}]   ;;  %s2452_s1 = inlined_call_operand.hbm [shape: f32[2,8,32], index: 1, kind: input, shape index: {}]   ;;  %s2453_s2 = inlined_call_operand.hbm [shape: f32[2,8,8], index: 2, kind: input, shape index: {}]   ;;  %s2454_s3 = inlined_call_operand.hbm [shape: f32[2,8,8], index: 3, kind: input, shape index: {}]   ;;  %s2455_s4 = inlined_call_operand.hbm [shape: f32[32,32], index: 4, kind: input, shape index: {}]   ;;  %s2456_s5 = inlined_call_operand.hbm [shape: f32[32,32], index: 5, kind: input, shape index: {}]   ;;  %s2457_s6 = inlined_call_operand.hbm [shape: f32[32,32], index: 6, kind: input, shape index: {}]   ;;  %s2458_s7 = inlined_call_operand.vmem [shape: f32[2,32], index: 7, kind: input, shape index: {}]   ;;  %s2459_s8 = inlined_call_operand.hbm [shape: f32[32,32], index: 8, kind: input, shape index: {}]   ;;  %s2460_s9 = inlined_call_operand.hbm [shape: f32[2,8,32], index: 9, kind: output, shape index: {}]  }
   0x1   :  { %2481 = sst [smem:[#allocation29_spill]] %s2451_s0 }
   0x2   :  { %2482 = sst [smem:[#allocation30_spill]] %s2452_s1 }
   0x3   :  { %2483 = sst [smem:[#allocation31_spill]] %s2455_s4 }
   0x4   :  { %2484 = sst [smem:[#allocation32_spill]] %s2456_s5 }
   0x5   :  { %2485 = sst [smem:[#allocation33_spill]] %s2460_s9 }
   0x6   :  { %14 = vsyncpa [#allocation3], 0 }
   0x7   :  { %16 = vsyncpa [#allocation3 + $0x1], 0 }
   0x8   :  { %17 = vsyncpa [#allocation6], 0 }
   0x9   :  { %19 = vsyncpa [#allocation6 + $0x1], 0 }
   0xa   :  { %20 = vsyncpa [#allocation9], 0 }
   0xb   :  { %22 = vsyncpa [#allocation9 + $0x1], 0 }
   0xc   :  { %23 = vsyncpa [#allocation12], 0 }
   0xd   :  { %24 = vsyncpa [#allocation15], 0 }
   0xe   :  { %25 = vsyncpa [#allocation4], 0 }
   0xf   :  { %27 = vsyncpa [#allocation4 + $0x1], 0  ;;  %s2058_s30 = smov 0   ;;  %s2060_s10 = smov 0  }
  0x10   :  { %s2062_s11 = smov 0   ;;  %s2064_s12 = smov 0  }
  0x11 LB: > { %2486 = sst [smem:[#allocation24_spill]] %s1979_s30  ;;  %s2079_s13 = sadd.s32 4294967295, %s1991_s12   ;;  %s1991_s12 = sphi %s2064_s12, %s2524_s12   ;;  %s1987_s11 = sphi %s2062_s11, %s2528_s11   ;;  %s1983_s10 = sphi %s2060_s10, %s2527_s10   ;;  %s1979_s30 = sphi %s2058_s30, %s2526_s30  }
  0x12   : > { %s1435_s14 = sadd.s32 4294967294, %s1991_s12   ;;  %p53_p0 = scmp.ne.s32.totalorder %s1983_s10, %s1979_s30 }
  0x13   : > { %p2469_p1 = scmp.eq.s32.totalorder %s2079_s13, 0  ;;  %p260_p2 = scmp.eq.s32.totalorder %s2079_s13, 1 }
  0x14   : > { %p266_p3 = scmp.eq.s32.totalorder %s1435_s14, 1  ;;  %p1436_p5 = scmp.ge.s32.totalorder %s1991_s12, 1 }
  0x15   : > { %p2088_p4 = por %p2469_p1, %p53_p0  ;;  %p273_p7 = scmp.lt.s32.totalorder %s1991_s12, 3 }
  0x16   : > { %p2093_p6 = por %p266_p3, %p53_p0  ;;  %s1993_s18 = smov [#allocation10]  }
  0x17   : > { %s2487_s15 = scalar_select %p2088_p4, 1, 0 }
  0x18   : > { %s2488_s16 = scalar_select %p2093_p6, 1, 0 }
  0x19   : > { %p2098_p8 = pnand %p1436_p5, %p273_p7  ;;  %s285_s19 = sshll.u32 %s1993_s18, 4  ;;  %s286_s19 = int_to_ptr.vmem [resolvable:$true] %s285_s19 }
  0x1a   : > { %2489 = sst [smem:[#allocation25_spill]] %s2488_s16  ;;  %s1994_s21 = smov [#allocation11]  }
  0x1b   : > { %s2490_s17 = scalar_select %p2098_p8, 1, 0 }
  0x1c   : > { %p1601_p9 = pneg %p2098_p8  ;;  %s298_s22 = sshll.u32 %s1994_s21, 4  ;;  %s299_s22 = int_to_ptr.vmem [resolvable:$true] %s298_s22 }
  0x1d   : > { %s1702_s23 = scalar_lea.vmem %s286_s19, 512  ;;  %p1710_p5 = scmp.lt.s32.totalorder %s286_s19, %s286_s19 }
  0x1e   : > { %p2107_p11 = pnand %p1601_p9, %p2469_p1  ;;  %p1703_p13 = scmp.ne.s32.totalorder %s286_s19, %s1702_s23 }
  0x1f   : > { %p1711_p7 = scmp.lt.s32.totalorder %s1702_s23, %s1702_s23 }
  0x20   : > { %s2491_s20 = scalar_select %p2107_p11, 1, 0 }
  0x21   : > { %p2470_p12 = pneg %p2107_p11  ;;  %p1712_p10 = por %p1711_p7, %p1710_p5 }
  0x23   : > { %p1705_p0 = pnand %p1703_p13, %p2470_p12 }
  0x25   : > { %p1706_p3 = pneg %p1705_p0 }
  0x27   : > { %p1713_p9 = pnand %p1712_p10, %p1706_p3 }
  0x29   : > { %1716 = shalt.err (!%p1713_p9)
}
  0x2a   : > { %s2461_s24 = smov 128   ;;  %s2464_s25 = smov 8  }
  0x2b   : > { %s2492_s4 = sld [smem:[#allocation31_spill]]  ;;  %s1728_s28 = scalar_lea.vmem %s299_s22, 512 }
  0x2c   : > { %p1729_p13 = scmp.ne.s32.totalorder %s299_s22, %s1728_s28  ;;  %p1736_p10 = scmp.lt.s32.totalorder %s299_s22, %s299_s22 }
  0x2d   : > { %p1737_p3 = scmp.lt.s32.totalorder %s1728_s28, %s1728_s28 }
  0x2e   : > { %p1731_p0 = pnand %p1729_p13, %p2470_p12 }
  0x2f   : > { %p1738_p7 = por %p1737_p3, %p1736_p10 }
  0x30   : > { %p1732_p5 = pneg %p1731_p0 }
  0x31   : > { %1604 = dma.hbm_to_vmem [thread:$0]  (!%p2107_p11), %s2492_s4, 512, %s286_s19, [#allocation9], %s2461_s24, %s2461_s24, %s2464_s25  }
  0x32   : > { %p1739_p9 = pnand %p1738_p7, %p1732_p5 }
  0x34   : > { %1742 = shalt.err (!%p1739_p9)
}
  0x35   : > { %s2493_s5 = sld [smem:[#allocation32_spill]]  ;;  %s2136_s18 = sadd.s32 1, %s1991_s12  }
  0x36   : > { %2494 = sst [smem:[#allocation26_spill]] %s2136_s18  ;;  %s40_s19 = sadd.s32 1, %s1987_s11 }
  0x37   : > { %s37_s21 = ssub.s32 %s1991_s12, %s2136_s18  ;;  %p47_p13 = scmp.ne.s32.totalorder %s1987_s11, %s1983_s10 }
  0x38   : > { %p38_p0 = scmp.eq.s32.totalorder %s37_s21, 0  ;;  %p48_p5 = scmp.eq.s32.totalorder %s1991_s12, 0 }
  0x39   : > { %p2146_p10 = por %p260_p2, %p47_p13  ;;  %p1635_p3 = scmp.lt.s32.totalorder %s1991_s12, 2 }
  0x3a   : > { %s2152_s26 = scalar_select %p38_p0, %s1987_s11, %s40_s19  }
  0x3b   : > { %1607 = dma.hbm_to_vmem [thread:$0]  (!%p2107_p11), %s2493_s5, 512, %s299_s22, [#allocation12], %s2461_s24, %s2461_s24, %s2464_s25  }
  0x3c   : > { %s2495_s23 = scalar_select %p2146_p10, 1, 0 }
  0x3d   : > { %2497 = sst [smem:[#allocation28_spill]] %s2152_s26  ;;  %p49_p7 = por %p48_p5, %p47_p13 }
  0x3e   : > { %2496 = sst [smem:[#allocation27_spill]] %s2495_s23  ;;  %s2463_s27 = sand.u32 1, %s1987_s11  }
  0x3f   : > { %s2157_s22 = sshll.u32 %s2463_s27, 3  ;;  %s2160_s28 = sshll.u32 %s1991_s12, 7 }
  0x40   : > { %p2162_p9 = pnand %p1635_p3, %p49_p7  ;;  %s2471_s14 = sand.u32 1, %s1991_s12  }
  0x41   : > { %s2499_s1 = sld [smem:[#allocation30_spill]]  ;;  %s363_s27 = scalar_lea.vmem [#allocation5], %s2157_s22 }
  0x42   : > { %s370_s25 = sshll.u32 %s363_s27, 4  ;;  %s2176_s4 = scalar_lea.sflag [#allocation6], %s2471_s14  ;;  %s371_s25 = int_to_ptr.vmem [resolvable:$true] %s370_s25 }
  0x43   : > { %p2182_p13 = pneg %p2162_p9 }
  0x47   : > { %s2171_s19 = scalar_lea.hbm %s2499_s1, %s2160_s28  ;;  %s1748_s18 = scalar_lea.hbm %s2499_s1, 256 }
  0x48   : > { %s1743_s5 = scalar_lea.hbm %s2171_s19, 128  ;;  %p1749_p3 = scmp.lt.s32.totalorder %s2171_s19, %s2499_s1 }
  0x49   : > { %p1744_p2 = scmp.ne.s32.totalorder %s2171_s19, %s1743_s5  ;;  %p1750_p7 = scmp.lt.s32.totalorder %s1748_s18, %s1743_s5 }
  0x4b   : > { %p1746_p0 = pnand %p2182_p13, %p1744_p2  ;;  %p1751_p1 = por %p1750_p7, %p1749_p3 }
  0x4d   : > { %p1747_p5 = pneg %p1746_p0 }
  0x4f   : > { %p1752_p12 = pnand %p1751_p1, %p1747_p5 }
  0x51   : > { %1755 = shalt.err (!%p1752_p12)
}
  0x52   : > { %s1756_s14 = scalar_lea.vmem %s371_s25, 128  ;;  %s1997_s30 = smov [#allocation5]  }
  0x53   : > { %p1757_p6 = scmp.ne.s32.totalorder %s371_s25, %s1756_s14  ;;  %s1761_s9 = sshll.u32 %s1997_s30, 4  ;;  %s1762_s9 = int_to_ptr.vmem [resolvable:$false] %s1761_s9 }
  0x54   : > { %s1763_s23 = scalar_lea.vmem %s1762_s9, 256  ;;  %p1764_p2 = scmp.lt.s32.totalorder %s371_s25, %s1762_s9 }
  0x55   : > { %p1759_p10 = pnand %p1757_p6, %p2182_p13  ;;  %p1765_p0 = scmp.lt.s32.totalorder %s1763_s23, %s1756_s14 }
  0x57   : > { %p1760_p4 = pneg %p1759_p10  ;;  %p1766_p8 = por %p1765_p0, %p1764_p2 }
  0x59   : > { %p1767_p11 = pnand %p1766_p8, %p1760_p4 }
  0x5b   : > { %1770 = shalt.err (!%p1767_p11)
}
  0x5c   : > { %1620 = dma.hbm_to_vmem [thread:$0]  (!%p2162_p9), %s2171_s19, 128, %s371_s25, %s2176_s4  }
  0x5d   : > { %s1998_s5 = smov [#allocation13]   ;;  %s1999_s18 = smov [#allocation14]  }
  0x5e   : > { %s311_s16 = sshll.u32 %s1998_s5, 4  ;;  %s327_s24 = sshll.u32 %s1999_s18, 4  ;;  %s312_s16 = int_to_ptr.vmem [resolvable:$true] %s311_s16  ;;  %s328_s24 = int_to_ptr.vmem [resolvable:$true] %s327_s24 }
  0x5f   : > { %s1782_s21 = scalar_lea.vmem %s312_s16, 512  ;;  %p2501_p6 = scmp.ne.s32.totalorder %s2491_s20, 0 }
  0x60   : > { %p1783_p1 = scmp.ne.s32.totalorder %s312_s16, %s1782_s21  ;;  %p1790_p3 = scmp.lt.s32.totalorder %s312_s16, %s312_s16 }
  0x61   : > { %p2502_p12 = pneg %p2501_p6  ;;  %p1791_p4 = scmp.lt.s32.totalorder %s1782_s21, %s1782_s21 }
  0x63   : > { %p1785_p10 = pnand %p1783_p1, %p2502_p12  ;;  %p1792_p8 = por %p1791_p4, %p1790_p3 }
  0x65   : > { %p1786_p5 = pneg %p1785_p10 }
  0x67   : > { %p1793_p11 = pnand %p1792_p8, %p1786_p5 }
  0x69   : > { %1796 = shalt.err (!%p1793_p11)
}
  0x6a   : > { %s2503_s9 = smov 8   ;;  %s2504_s30 = smov 128  }
  0x6b   : > { %1610 = dma.hbm_to_vmem [thread:$0]  (!%p2501_p6), %s2457_s6, 512, %s312_s16, [#allocation12], %s2504_s30, %s2504_s30, %s2503_s9  }
  0x6c   : > { %s1808_s14 = scalar_lea.vmem %s328_s24, 512  ;;  %p2505_p2 = pmov %p2502_p12 }
  0x6d   : > { %p1809_p7 = scmp.ne.s32.totalorder %s328_s24, %s1808_s14  ;;  %p1816_p12 = scmp.lt.s32.totalorder %s328_s24, %s328_s24 }
  0x6e   : > { %p1817_p10 = scmp.lt.s32.totalorder %s1808_s14, %s1808_s14 }
  0x6f   : > { %p1811_p0 = pnand %p1809_p7, %p2505_p2 }
  0x70   : > { %p1818_p5 = por %p1817_p10, %p1816_p12 }
  0x71   : > { %p1812_p1 = pneg %p1811_p0 }
  0x73   : > { %p1819_p3 = pnand %p1818_p5, %p1812_p1 }
  0x75   : > { %1822 = shalt.err (!%p1819_p3)
}
  0x76   : > { %1613 = dma.hbm_to_vmem [thread:$0]  (!%p2501_p6), %s2459_s8, 512, %s328_s24, [#allocation15], %s2504_s30, %s2504_s30, %s2503_s9  }
  0x77   : > { %s2506_s0 = sld [smem:[#allocation29_spill]]  ;;  %s345_s20 = scalar_lea.vmem [#allocation2], %s2157_s22 }
  0x78   : > { %s352_s21 = sshll.u32 %s345_s20, 4  ;;  %s2234_s14 = scalar_lea.hbm %s2453_s2, %s2160_s28  ;;  %s353_s21 = int_to_ptr.vmem [resolvable:$true] %s352_s21 }
  0x79   : > { %s2507_s19 = sand.u32 1, %s1987_s11  }
  0x7a   : > { %s342_s27 = scalar_lea.sflag [#allocation3], %s2507_s19 }
  0x7d   : > { %s2227_s18 = scalar_lea.hbm %s2506_s0, %s2160_s28  ;;  %s1828_s30 = scalar_lea.hbm %s2506_s0, 256 }
  0x7e   : > { %s1823_s1 = scalar_lea.hbm %s2227_s18, 128  ;;  %p1829_p11 = scmp.lt.s32.totalorder %s2227_s18, %s2506_s0 }
  0x7f   : > { %p1824_p6 = scmp.ne.s32.totalorder %s2227_s18, %s1823_s1  ;;  %p1830_p7 = scmp.lt.s32.totalorder %s1828_s30, %s1823_s1 }
  0x81   : > { %p1826_p4 = pnand %p1824_p6, %p2182_p13  ;;  %p1831_p2 = por %p1830_p7, %p1829_p11 }
  0x83   : > { %p1827_p8 = pneg %p1826_p4 }
  0x85   : > { %p1832_p0 = pnand %p1831_p2, %p1827_p8 }
  0x87   : > { %1835 = shalt.err (!%p1832_p0)
}
  0x88   : > { %s1836_s20 = scalar_lea.vmem %s353_s21, 128  ;;  %s2000_s25 = smov [#allocation2]  }
  0x89   : > { %p1837_p1 = scmp.ne.s32.totalorder %s353_s21, %s1836_s20  ;;  %s1841_s23 = sshll.u32 %s2000_s25, 4  ;;  %s1842_s23 = int_to_ptr.vmem [resolvable:$false] %s1841_s23 }
  0x8a   : > { %s1843_s19 = scalar_lea.vmem %s1842_s23, 256  ;;  %p1844_p5 = scmp.lt.s32.totalorder %s353_s21, %s1842_s23 }
  0x8b   : > { %p1839_p12 = pnand %p1837_p1, %p2182_p13  ;;  %p1845_p3 = scmp.lt.s32.totalorder %s1843_s19, %s1836_s20 }
  0x8d   : > { %p1840_p10 = pneg %p1839_p12  ;;  %p1846_p6 = por %p1845_p3, %p1844_p5 }
  0x8f   : > { %p1847_p4 = pnand %p1846_p6, %p1840_p10 }
  0x91   : > { %1850 = shalt.err (!%p1847_p4)
}
  0x92   : > { %1617 = dma.hbm_to_vmem [thread:$0]  (!%p2162_p9), %s2227_s18, 128, %s353_s21, %s342_s27  }
  0x93   : > { %s381_s1 = scalar_lea.vmem [#allocation7], %s2157_s22  ;;  %s2259_s5 = scalar_lea.hbm %s2454_s3, %s2160_s28 }
  0x94   : > { %s388_s24 = sshll.u32 %s381_s1, 4  ;;  %s1851_s16 = scalar_lea.hbm %s2234_s14, 128  ;;  %s389_s24 = int_to_ptr.vmem [resolvable:$true] %s388_s24 }
  0x95   : > { %p1852_p8 = scmp.ne.s32.totalorder %s2234_s14, %s1851_s16  ;;  %s1856_s23 = scalar_lea.hbm %s2453_s2, 256 }
  0x96   : > { %p1857_p2 = scmp.lt.s32.totalorder %s2234_s14, %s2453_s2  ;;  %p1858_p0 = scmp.lt.s32.totalorder %s1856_s23, %s1851_s16 }
  0x97   : > { %p1854_p11 = pnand %p1852_p8, %p2182_p13 }
  0x98   : > { %p1859_p1 = por %p1858_p0, %p1857_p2 }
  0x99   : > { %p1855_p7 = pneg %p1854_p11 }
  0x9b   : > { %p1860_p12 = pnand %p1859_p1, %p1855_p7 }
  0x9d   : > { %1863 = shalt.err (!%p1860_p12)
}
  0x9e   : > { %s1864_s18 = scalar_lea.vmem %s389_s24, 128  ;;  %s2001_s28 = smov [#allocation7]  }
  0x9f   : > { %p1865_p10 = scmp.ne.s32.totalorder %s389_s24, %s1864_s18  ;;  %s1869_s21 = sshll.u32 %s2001_s28, 4  ;;  %s1870_s21 = int_to_ptr.vmem [resolvable:$false] %s1869_s21 }
  0xa0   : > { %s1871_s27 = scalar_lea.vmem %s1870_s21, 256  ;;  %p1872_p6 = scmp.lt.s32.totalorder %s389_s24, %s1870_s21 }
  0xa1   : > { %p1867_p5 = pnand %p1865_p10, %p2182_p13  ;;  %p1873_p4 = scmp.lt.s32.totalorder %s1871_s27, %s1864_s18 }
  0xa3   : > { %p1868_p3 = pneg %p1867_p5  ;;  %p1874_p8 = por %p1873_p4, %p1872_p6 }
  0xa5   : > { %p1875_p11 = pnand %p1874_p8, %p1868_p3 }
  0xa7   : > { %1878 = shalt.err (!%p1875_p11)
}
  0xa8   : > { %1623 = dma.hbm_to_vmem [thread:$0]  (!%p2162_p9), %s2234_s14, 128, %s389_s24, %s2176_s4  }
  0xa9   : > { %s399_s0 = scalar_lea.vmem [#allocation8], %s2157_s22  ;;  %s2508_s9 = sand.u32 1, %s1991_s12  }
  0xaa   : > { %s406_s1 = sshll.u32 %s399_s0, 4  ;;  %s396_s30 = scalar_lea.sflag [#allocation9], %s2508_s9  ;;  %s407_s1 = int_to_ptr.vmem [resolvable:$true] %s406_s1 }
  0xab   : > { %s1879_s16 = scalar_lea.hbm %s2259_s5, 128  ;;  %s1884_s23 = scalar_lea.hbm %s2454_s3, 256 }
  0xac   : > { %p1880_p7 = scmp.ne.s32.totalorder %s2259_s5, %s1879_s16  ;;  %p1885_p1 = scmp.lt.s32.totalorder %s2259_s5, %s2454_s3 }
  0xad   : > { %p1886_p12 = scmp.lt.s32.totalorder %s1884_s23, %s1879_s16 }
  0xae   : > { %p1882_p2 = pnand %p1880_p7, %p2182_p13 }
  0xaf   : > { %p1887_p10 = por %p1886_p12, %p1885_p1 }
  0xb0   : > { %p1883_p0 = pneg %p1882_p2 }
  0xb2   : > { %p1888_p5 = pnand %p1887_p10, %p1883_p0 }
  0xb4   : > { %1891 = shalt.err (!%p1888_p5)
}
  0xb5   : > { %s1892_s4 = scalar_lea.vmem %s407_s1, 128  ;;  %s2002_s22 = smov [#allocation8]  }
  0xb6   : > { %p1893_p3 = scmp.ne.s32.totalorder %s407_s1, %s1892_s4  ;;  %s1897_s14 = sshll.u32 %s2002_s22, 4  ;;  %s1898_s14 = int_to_ptr.vmem [resolvable:$false] %s1897_s14 }
  0xb7   : > { %s1899_s24 = scalar_lea.vmem %s1898_s14, 256  ;;  %p1900_p8 = scmp.lt.s32.totalorder %s407_s1, %s1898_s14 }
  0xb8   : > { %p1895_p6 = pnand %p1893_p3, %p2182_p13  ;;  %p1901_p11 = scmp.lt.s32.totalorder %s1899_s24, %s1892_s4 }
  0xba   : > { %p1896_p4 = pneg %p1895_p6  ;;  %p1902_p7 = por %p1901_p11, %p1900_p8 }
  0xbc   : > { %p1903_p2 = pnand %p1902_p7, %p1896_p4 }
  0xbe   : > { %1906 = shalt.err (!%p1903_p2)
}
  0xbf   : > { %1626 = dma.hbm_to_vmem [thread:$0]  (!%p2162_p9), %s2259_s5, 128, %s407_s1, %s396_s30  }
  0xc0   : > { %p2509_p0 = scmp.ne.s32.totalorder %s2490_s17, 0 }
  0xc1   : > { %s2300_s26 = sand.u32 (!%p2509_p0), 1, %s1983_s10   ;;  %p2510_p13 = scmp.ne.s32.totalorder (!%p2509_p0), %s2487_s15, 0 }
  0xc2   : > { %415 = sbr.rel (%p2509_p0) target bundleno = 1410 (0x582), region = 56  ;;  %s2303_s28 = sshll.u32 (!%p2509_p0), %s2300_s26, 3 }
  0xc3   : > { %s418_s21 = scalar_lea.sflag (!%p2509_p0), [#allocation3], %s2300_s26  ;;  %s421_s27 = scalar_lea.vmem (!%p2509_p0), [#allocation2], %s2303_s28 }
  0xc7   : > { %1950 = dma.done.wait (%p2510_p13), %s418_s21, 128  }
  0xc8   : > { %1952 = vsyncadd (%p2510_p13), %s418_s21, 4294967168  ;;  %s426_s17 = sand.u32 1, %s2079_s13   ;;  %s430_s5 = scalar_lea.vmem [#allocation5], %s2303_s28 }
  0xc9   : > { %s427_s29 = scalar_lea.sflag [#allocation6], %s426_s17 }
  0xca   : > { %1954 = dma.done.wait (%p2510_p13), %s427_s29, 256  }
  0xcb   : > { %1956 = vsyncadd (%p2510_p13), %s427_s29, 4294967040  ;;  %s439_s0 = scalar_lea.vmem [#allocation7], %s2303_s28  ;;  %s445_s1 = scalar_lea.sflag [#allocation9], %s426_s17 }
  0xcc   : > { %s448_s9 = scalar_lea.vmem [#allocation8], %s2303_s28 }
  0xcd   : > { %1958 = dma.done.wait (%p2510_p13), %s445_s1, 128  }
  0xce   : > { %1960 = vsyncadd (%p2510_p13), %s445_s1, 4294967168  ;;  %p2511_p9 = scmp.eq.s32.totalorder %s2079_s13, 0 }
  0xd0   : > { %1962 = dma.done.wait (%p2511_p9), [#allocation9], 512   ;;  %p2512_p1 = pmov %p2511_p9 }
  0xd2   : > { %1964 = vsyncadd (%p2512_p1), [#allocation9], 4294966784  ;;  %p2513_p12 = pmov %p2512_p1 }
  0xd3   : > { %p2514_p10 = pmov %p2512_p1 }
  0xd4   : > { %1966 = dma.done.wait (%p2513_p12), [#allocation12], 1024  }
  0xd5   : > { %1968 = vsyncadd (%p2514_p10), [#allocation12], 4294966272  ;;  %p2515_p5 = pmov %p2512_p1 }
  0xd6   : > { %p2516_p3 = pmov %p2512_p1 }
  0xd7   : > { %1970 = dma.done.wait (%p2515_p5), [#allocation15], 512  }
  0xd8   : > { %1972 = vsyncadd (%p2516_p3), [#allocation15], 4294966784  ;;  %v2003_v0 = vmov 0.0   ;;  %vm2004_vm0 = vmmov 0   ;;  %v519_v1 = vld [vmem:[#allocation10 + $0x18] sm:$0xff]  ;;  %v518_v3 = vld [vmem:[#allocation10 + $0x10] sm:$0xff]  ;;  %v824_v21 = vlaneseq }
  0xd9   : > { %1506 = vmatprep.subr.mxu0 %v2003_v0  ;;  %1517 = vmatprep.subr.mxu1 %v2003_v0  ;;  %v598_v2 = vld [vmem:[#allocation11 + $0x18] sm:$0xff]  ;;  %v597_v4 = vld [vmem:[#allocation11 + $0x10] sm:$0xff]  ;;  %v517_v5 = vld [vmem:[#allocation10 + $0x8] sm:$0xff]  ;;  %vm520_vm1 = vcmask 261120   ;;  %vm829_vm2 = vcmask 130048   ;;  %s2005_s16 = smov 112  }
  0xda   : > { %1514 = vmatprep.mubr.msk.f32.mxu0 %vm2004_vm0, %v2003_v0  ;;  %1525 = vmatprep.mubr.msk.f32.mxu1 %vm2004_vm0, %v2003_v0  ;;  %v596_v6 = vld [vmem:[#allocation11 + $0x8] sm:$0xff]  ;;  %v516_v7 = vld [vmem:[#allocation10] sm:$0xff]  ;;  %v515_v10 = vld [vmem:[%s430_s5] sm:$0xff]  ;;  %v825_v22 = vshrl.u32 %v824_v21, 7  ;;  %vm907_vm3 = vcmask 64512   ;;  %s2006_s20 = smov 16  }
  0xdb   : > { %1507 = vmatpush3.msra.mxu0 %v519_v1  ;;  %1518 = vmatpush3.msra.mxu1 %v598_v2  ;;  %v595_v8 = vld [vmem:[#allocation11] sm:$0xff]  ;;  %v675_v12 = vld [vmem:[#allocation13 + $0x18] sm:$0xff]  ;;  %v674_v13 = vld [vmem:[#allocation13 + $0x10] sm:$0xff]  ;;  %s2517_s25 = sld [smem:[#allocation27_spill]]  ;;  %s1473_s23 = sshll.u32 %s2079_s13, 7 }
  0xdc   : > { %1508 = vmatprep.subr.mxu0 %v2003_v0  ;;  %1519 = vmatprep.subr.mxu1 %v2003_v0  ;;  %v514_v9 = vld [vmem:[%s421_s27] sm:$0xff]  ;;  %v994_v23 = vsub.s32 1, %v825_v22  ;;  %v822_v27 = vld [vmem:[%s448_s9] sm:$0xff]  ;;  %v826_v32 = vsub.s32 0, %v825_v22  ;;  %s513_s19 = scalar_lea.vmem [#allocation16], %s2303_s28  ;;  %s2518_s14 = sld [smem:[#allocation33_spill]] }
  0xdd   : > { %1509 = vmatpush3.msra.mxu0 %v518_v3  ;;  %1520 = vmatpush3.msra.mxu1 %v597_v4  ;;  %v746_v11 = vld [vmem:[%s2458_s7] sm:$0x3]  ;;  %v673_v14 = vld [vmem:[#allocation13 + $0x8] sm:$0xff]  ;;  %v823_v28 = vmul.f32 0.25, %v822_v27  ;;  %v1172_v60 = vld [vmem:[#allocation14 + $0x18] sm:$0xff]  ;;  %s1261_s18 = sshll.u32 %s513_s19, 4  ;;  %s2409_s18 = int_to_ptr.vmem [resolvable:$true] %s1261_s18 }
  0xde   : > { %1510 = vmatprep.subr.mxu0 %v2003_v0  ;;  %1521 = vmatprep.subr.mxu1 %v2003_v0  ;;  %v672_v15 = vld [vmem:[#allocation13] sm:$0xff]  ;;  %v1171_v61 = vld [vmem:[#allocation14 + $0x10] sm:$0xff]  ;;  %v1170_v62 = vld [vmem:[#allocation14 + $0x8] sm:$0xff]  ;;  %s1248_s21 = scalar_lea.sflag [#allocation4], %s2300_s26  ;;  %s1907_s27 = scalar_lea.vmem %s2409_s18, 128 }
  0xdf   : > { %1511 = vmatpush3.msra.mxu0 %v517_v5  ;;  %1522 = vmatpush3.msra.mxu1 %v596_v6  ;;  %v820_v34 = vld [vmem:[%s439_s0] sm:$0xff]  ;;  %p1908_p6 = scmp.ne.s32.totalorder %s2409_s18, %s1907_s27  ;;  %s2007_s13 = smov [#allocation16]  }
  0xe0   : > { %1512 = vmatprep.subr.mxu0 %v2003_v0  ;;  %1523 = vmatprep.subr.mxu1 %v2003_v0  ;;  %v821_v38 = vmul.f32 3.4028235e+38, %v820_v34  ;;  %v1169_v3 = vld [vmem:[#allocation14] sm:$0xff]  ;;  %s1911_s28 = sshll.u32 %s2007_s13, 4  ;;  %s1912_s28 = int_to_ptr.vmem [resolvable:$false] %s1911_s28 }
  0xe1   : > { %1513 = vmatpush3.msra.mxu0 %v516_v7  ;;  %1524 = vmatpush3.msra.mxu1 %v595_v8  ;;  %p2519_p4 = scmp.ne.s32.totalorder %s2517_s25, 0  ;;  %s1913_s17 = scalar_lea.vmem %s1912_s28, 256 }
  0xe2   : > { %1515 = vmatmul.mubr.msk.f32.vlgmr.msra.gmra.mxu0 %vm520_vm1, %v514_v9  ;;  %1526 = vmatmul.mubr.msk.f32.vlgmr.msra.gmra.mxu1 %vm520_vm1, %v515_v10  ;;  %s2407_s24 = scalar_lea.hbm %s2518_s14, %s1473_s23  ;;  %p1914_p7 = scmp.lt.s32.totalorder %s2409_s18, %s1912_s28 }
  0xe3   : > { %1539 = vmatprep.subr.mxu1 %v2003_v0  ;;  %1541 = vmatprep.mubr.msk.f32.mxu1 %vm2004_vm0, %v2003_v0  ;;  %p1909_p8 = pnand %p1908_p6, %p2519_p4  ;;  %p1915_p2 = scmp.lt.s32.totalorder %s1913_s17, %s1907_s27 }
  0xe4   : > { %1540 = vmatpush3.xpose.msk.msra.mxu1 %vm520_vm1, %v515_v10  ;;  %1528 = vmatprep.subr.mxu0 %v2003_v0 }
  0xe5   : > { %1544 = vmatprep.subr.mxu1 %v2003_v0  ;;  %1536 = vmatprep.mubr.msk.f32.mxu0 %vm2004_vm0, %v2003_v0  ;;  %p1910_p11 = pneg %p1909_p8  ;;  %p1916_p0 = por %p1915_p2, %p1914_p7 }
  0xe6   : > { %1529 = vmatpush3.msra.mxu0 %v675_v12 }
  0xe7   : > { %1542 = vmatmul.mubr.msk.f32.vlgmr.msra.gmra.mxu1 %vm520_vm1, %v746_v11  ;;  %1530 = vmatprep.subr.mxu0 %v2003_v0  ;;  %p1917_p13 = pnand %p1916_p0, %p1910_p11 }
  0xe8   : > { %1546 = vmatprep.mubr.msk.f32.mxu1 %vm2004_vm0, %v2003_v0  ;;  %1531 = vmatpush3.msra.mxu0 %v674_v13 }
  0xe9   : > { %1532 = vmatprep.subr.mxu0 %v2003_v0 }
  0xea   : > { %1533 = vmatpush3.msra.mxu0 %v673_v14 }
  0xeb   : > { %1534 = vmatprep.subr.mxu0 %v2003_v0 }
  0xec   : > { %1535 = vmatpush3.msra.mxu0 %v672_v15 }
  0xed   : > { %1537 = vmatmul.mubr.msk.f32.vlgmr.msra.gmra.mxu0 %vm520_vm1, %v515_v10  ;;  %1549 = vmatprep.subr.mxu0 %v2003_v0 }
  0xee   : > { %1551 = vmatprep.mubr.msk.f32.mxu0 %vm2004_vm0, %v2003_v0 }
 0x1a2   : > { %v590_v16 = vpop.f32.mrf.mxu0  ;;  %v668_v17 = vpop.f32.mrf.mxu1 }
 0x1a3   : > { %v594_v18 = vmul.f32 0.25, %v590_v16  ;;  %999 = vrot.lane.b32.xlu0 %v668_v17, %s2005_s16  ;;  %1545 = vmatpush3.xpose.msk.msra.mxu1 %vm829_vm2, %v668_v17 }
 0x1a4   : > { %v1516_v19 = vpop.f32.mrf.mxu0  ;;  %v1527_v20 = vpop.f32.mrf.mxu1  ;;  %1554 = vmatprep.subr.mxu1 %v2003_v0 }
 0x1a6   : > { %1547 = vmatmul.mubr.msk.f32.vlgmr.msra.gmra.mxu1 %vm829_vm2, %v594_v18 }
 0x1a7   : > { %997 = vrot.lane.b32.xlu0 %v594_v18, %s2005_s16  ;;  %1556 = vmatprep.mubr.msk.f32.mxu1 %vm2004_vm0, %v2003_v0  ;;  %v816_v24 = vpop.f32.mrf.mxu1 }
 0x1a8   : > { %v995_v25 = vrot.slane %v816_v24, %v994_v23  ;;  %v827_v33 = vrot.slane %v816_v24, %v826_v32 }
 0x1a9   : > { %v1543_v26 = vpop.f32.mrf.mxu1 }
 0x1aa   : > { %v996_v29 = vmul.f32 %v995_v25, %v823_v28  ;;  %v828_v36 = vmul.f32 %v827_v33, %v823_v28 }
 0x1ad   : > { %v742_v35 = vpop.f32.mrf.mxu0 }
 0x1ae   : > { %1086 = vrot.lane.b32.xlu0 %v742_v35, %s2005_s16  ;;  %1550 = vmatpush3.msra.mxu0 %v742_v35 }
 0x1af   : > { %v1538_v37 = vpop.f32.mrf.mxu0  ;;  %1559 = vmatprep.subr.mxu0 %v2003_v0 }
 0x215   : > { %v1000_v30 = vpop.permute.xlu0 %999 }
 0x216   : > { %1555 = vmatpush3.xpose.msk.msra.mxu1 %vm829_vm2, %v1000_v30 }
 0x217   : > { %1564 = vmatprep.subr.mxu1 %v2003_v0 }
 0x219   : > { %v998_v31 = vpop.permute.xlu0 %997 }
 0x21a   : > { %1557 = vmatmul.mubr.msk.f32.vlgmr.msra.gmra.mxu1 %vm829_vm2, %v998_v31 }
 0x21b   : > { %1572 = vmatprep.mubr.msk.f32.mxu1 %vm2004_vm0, %v2003_v0  ;;  %1565 = vmatpush3.msra.mxu1 %v1172_v60 }
 0x21c   : > { %1566 = vmatprep.subr.mxu1 %v2003_v0 }
 0x21d   : > { %1567 = vmatpush3.msra.mxu1 %v1171_v61 }
 0x21e   : > { %1568 = vmatprep.subr.mxu1 %v2003_v0 }
 0x21f   : > { %1569 = vmatpush3.msra.mxu1 %v1170_v62 }
 0x220   : > { %v1087_v52 = vpop.permute.xlu0 %1086  ;;  %1570 = vmatprep.subr.mxu1 %v2003_v0 }
 0x221   : > { %1571 = vmatpush3.msra.mxu1 %v1169_v3 }
 0x266   : > { %v902_v39 = vpop.f32.mrf.mxu1 }
 0x267   : > { %v903_v40 = vadd.f32 %v902_v39, %v828_v36 }
 0x268   : > { %v1548_v41 = vpop.f32.mrf.mxu1 }
 0x269   : > { %v906_v42 = vsub.f32 %v903_v40, %v821_v38 }
 0x26b   : > { %v908_v43 = vsel %vm907_vm3, %v906_v42, -inf }
 0x26c   : > { %909 = vmax.xlane.f32.xlu1 %v908_v43 }
 0x2da   : > { %v1071_v44 = vpop.f32.mrf.mxu1 }
 0x2db   : > { %v1072_v45 = vadd.f32 %v1071_v44, %v996_v29 }
 0x2dc   : > { %v1558_v46 = vpop.f32.mrf.mxu1 }
 0x2dd   : > { %v1075_v47 = vsub.f32 %v1072_v45, %v821_v38 }
 0x2df   : > { %v1076_v48 = vsel %vm907_vm3, %v1075_v47, -inf }
 0x2e0   : > { %1077 = vmax.xlane.f32.xlu1 %v1076_v48 }
 0x2f5   : > { %v910_v49 = vpop.xlane.xlu1 %909 }
 0x2f6   : > { %v911_v50 = vsub.f32 %v906_v42, %v910_v49 }
 0x2f8   : > { %v912_v51 = vmul.f32 1.442695, %v911_v50 }
 0x2fa   : > { %1683 = vpow2.f32 %v912_v51 }
 0x307   : > { %v1684_v53 = vpop.eup %1683 }
 0x308   : > { %1552 = vmatmul.mubr.msk.f32.vlgmr.msra.gmra.mxu0 %vm907_vm3, %v1684_v53  ;;  %v914_v54 = vsel %vm907_vm3, %v1684_v53, 0.0 }
 0x309   : > { %915 = vadd.xlane.f32.xlu0 %v914_v54  ;;  %1560 = vmatpush3.msra.mxu0 %v1087_v52 }
 0x30a   : > { %1561 = vmatprep.mubr.msk.f32.mxu0 %vm2004_vm0, %v2003_v0 }
 0x369   : > { %v1078_v55 = vpop.xlane.xlu1 %1077 }
 0x36a   : > { %v1079_v56 = vsub.f32 %v1075_v47, %v1078_v55 }
 0x36c   : > { %v1080_v57 = vmul.f32 1.442695, %v1079_v56 }
 0x36e   : > { %1685 = vpow2.f32 %v1080_v57 }
 0x37b   : > { %v1686_v58 = vpop.eup %1685 }
 0x37c   : > { %1562 = vmatmul.mubr.msk.f32.vlgmr.msra.gmra.mxu0 %vm907_vm3, %v1686_v58  ;;  %v1082_v59 = vsel %vm907_vm3, %v1686_v58, 0.0 }
 0x37d   : > { %1083 = vadd.xlane.f32.xlu1 %v1082_v59 }
 0x392   : > { %v916_v8 = vpop.xlane.xlu0 %915 }
 0x3c8   : > { %v986_v63 = vpop.f32.mrf.mxu0 }
 0x3ca   : > { %v1553_v1 = vpop.f32.mrf.mxu0 }
 0x406   : > { %v1084_v2 = vpop.xlane.xlu1 %1083 }
 0x407   : > { %1687 = vrcp.f32 %v1084_v2 }
 0x408   : > { %1689 = vrcp.f32 %v916_v8 }
 0x414   : > { %v1688_v4 = vpop.eup %1687 }
 0x415   : > { %v1690_v9 = vpop.eup %1689 }
 0x416   : > { %v991_v0 = vmul.f32 %v1690_v9, %v986_v63 }
 0x43c   : > { %v1158_v5 = vpop.f32.mrf.mxu0 }
 0x43d   : > { %v1163_v6 = vmul.f32 %v1688_v4, %v1158_v5 }
 0x43e   : > { %v1563_v7 = vpop.f32.mrf.mxu0 }
 0x43f   : > { %1165 = vrot.lane.b32.xlu1 %v1163_v6, %s2006_s20 }
 0x4b1   : > { %v1166_v10 = vpop.permute.xlu1 %1165 }
 0x4b2   : > { %v1168_v11 = vsel %vm829_vm2, %v991_v0, %v1166_v10 }
 0x4b3   : > { %1573 = vmatmul.mubr.msk.f32.vlgmr.msra.gmra.mxu1 %vm520_vm1, %v1168_v11 }
 0x573   : > { %v1242_v12 = vpop.f32.mrf.mxu1 }
 0x574   : > { %1246 = vst.msk [vmem:[%s513_s19] sm:$0xff] %vm520_vm1, %v1242_v12 }
 0x575   : > { %v1574_v13 = vpop.f32.mrf.mxu1 }
 0x576   : > { %1920 = shalt.err (!%p1917_p13)
}
 0x577   : > { %s1921_s29 = scalar_lea.hbm %s2407_s24, 128  ;;  %s1925_s0 = scalar_lea.hbm %s2518_s14, 256 }
 0x578   : > { %p1922_p9 = scmp.ne.s32.totalorder %s2407_s24, %s1921_s29  ;;  %p1926_p10 = scmp.lt.s32.totalorder %s2407_s24, %s2518_s14 }
 0x579   : > { %p1927_p5 = scmp.lt.s32.totalorder %s1925_s0, %s1921_s29 }
 0x57a   : > { %p1923_p1 = pnand %p1922_p9, %p2519_p4 }
 0x57b   : > { %p1928_p3 = por %p1927_p5, %p1926_p10 }
 0x57c   : > { %p1924_p12 = pneg %p1923_p1 }
 0x57e   : > { %p1929_p6 = pnand %p1928_p3, %p1924_p12 }
 0x580   : > { %1932 = shalt.err (!%p1929_p6)
}
 0x581   : > { %1599 = dma.vmem_to_hbm [thread:$0]  (%p2519_p4), %s2409_s18, 128, %s2407_s24, %s1248_s21  }
 0x582 PF: > { %s2520_s15 = sld [smem:[#allocation24_spill]]  ;;  %p2523_p11 = scmp.ge.s32.totalorder %s1991_s12, 2 }
 0x583   : > { %s2521_s30 = sld [smem:[#allocation25_spill]] }
 0x588   : > { %s1273_s16 = sand.u32 1, %s2520_s15  }
 0x589   : > { %p2522_p8 = scmp.ne.s32.totalorder %s2521_s30, 0  ;;  %s1274_s20 = scalar_lea.sflag [#allocation4], %s1273_s16 }
 0x58b   : > { %p1628_p7 = pnand %p2523_p11, %p2522_p8 }
 0x58d   : > { %p1629_p2 = pneg %p1628_p7 }
 0x58f   : > { %1974 = dma.done.wait (%p1629_p2), %s1274_s20, 128  }
 0x590   : > { %1976 = vsyncadd (%p1629_p2), %s1274_s20, 4294967168  ;;  %s2524_s12 = sld [smem:[#allocation26_spill]]  ;;  %s2526_s30 = smov %s1983_s10 }
 0x591   : > { %s2525_s23 = sld [smem:[#allocation28_spill]]  ;;  %s2527_s10 = smov %s1987_s11 }
 0x596   : > { %p30_p0 = scmp.ge.s32.totalorder %s2524_s12, 4  }
 0x597   : > { %s2528_s11 = smov %s2525_s23 }
 0x598   :  { %32 = sbr.rel (!%p30_p0) target bundleno = 17 (0x11), region = 154 }
 0x59d   :  { %1279 = vsyncpa [#allocation3], 1 }
 0x59e   :  { %1281 = vsyncpa [#allocation3 + $0x1], 1 }
 0x59f   :  { %1282 = vsyncpa [#allocation6], 1 }
 0x5a0   :  { %1284 = vsyncpa [#allocation6 + $0x1], 1 }
 0x5a1   :  { %1285 = vsyncpa [#allocation9], 1 }
 0x5a2   :  { %1287 = vsyncpa [#allocation9 + $0x1], 1 }
 0x5a3   :  { %1288 = vsyncpa [#allocation12], 1 }
 0x5a4   :  { %1289 = vsyncpa [#allocation15], 1 }
 0x5a5   :  { %1290 = vsyncpa [#allocation4], 1 }
 0x5a6   :  { %1292 = vsyncpa [#allocation4 + $0x1], 1 }

</bundles_post_ra>
